<compile_context>
chip_gen: v6e
topology: v6e:2x2x1
jax: 0.10.0
libtpu: 0.0.40
codegen_flags: <defaults>
</compile_context>

<pallas_src>
import functools
import math

import jax
import jax.numpy as jnp
from jax.experimental import pallas as pl
from jax.experimental.pallas import tpu as pltpu

_SUBLANE = 8        # f32 sublane count (vreg second-minor)
_MXU_M = 256        # v6e/v7x MXU M-dim; also a multiple of the bf16 packing (16)


def _round_up(x, m):
    return ((x + m - 1) // m) * m


# ----------------------------------------------------------------------------
# Kernel
# ----------------------------------------------------------------------------
def _mlp_kernel(x_ref, *refs, precision=None):
    """Fused MLP forward over one (tm, state_dim) batch tile.

    refs = (w0, b0, w1, b1, ..., wL, bL, out_ref)
    Hidden layers: ReLU(h @ Wi + bi); final layer: linear only.
    Weights may be bf16 (fed straight to the MXU, f32 accumulation); bias add
    and ReLU run in f32.  Each output row depends only on its own input row,
    so ragged last-tile garbage rows never contaminate real rows.
    """
    out_ref = refs[-1]
    param_refs = refs[:-1]
    n_layers = len(param_refs) // 2

    h = x_ref[...]                                           # (tm, state_dim)
    for i in range(n_layers):
        w = param_refs[2 * i][...]                           # (din, dout) f32 or bf16
        b = param_refs[2 * i + 1][...].astype(jnp.float32)   # (1, dout) f32
        acc = jnp.dot(h.astype(w.dtype), w,
                      preferred_element_type=jnp.float32,
                      precision=precision)                    # MXU, f32 accumulate
        acc = acc + b
        if i < n_layers - 1:
            acc = jnp.maximum(acc, 0.0)                       # ReLU (hidden only)
        h = acc                                               # f32 activations
    out_ref[...] = h.astype(out_ref.dtype)                    # (tm, action_dim)


# ----------------------------------------------------------------------------
# Parameters
# ----------------------------------------------------------------------------
def init_policy_params(key, state_dim, action_dim, hidden_units):
    """Init matching nn.Linear's U(-1/sqrt(fan_in), 1/sqrt(fan_in)).

    Weights are stored transposed vs PyTorch: (in_features, out_features).
    Biases are stored as (1, out_features).  No padding of any kind.
    """
    dims = [state_dim] + list(hidden_units) + [action_dim]
    params = []
    for i in range(len(dims) - 1):
        fan_in, fan_out = dims[i], dims[i + 1]
        key, wk, bk = jax.random.split(key, 3)
        bound = 1.0 / math.sqrt(fan_in)
        w = jax.random.uniform(wk, (fan_in, fan_out), jnp.float32, -bound, bound)
        b = jax.random.uniform(bk, (1, fan_out), jnp.float32, -bound, bound)
        params.append((w, b))
    return params


def cast_policy_params(params, *, param_dtype=jnp.bfloat16):
    """Cast weights to `param_dtype` (bf16 = native MXU input dtype, halves
    weight DMA bytes and avoids multi-pass f32 MXU emulation, biggest relative
    win on v5e).  Biases stay f32 (bias add / ReLU run in f32 on the VPU).
    NOTE: the bf16 path also truncates inter-layer activations to bf16 at each
    MXU input; use param_dtype=jnp.float32 if f32-faithful logits are needed.
    """
    return [(w.astype(param_dtype), b.astype(jnp.float32)) for w, b in params]


# ----------------------------------------------------------------------------
# Wrapper
# ----------------------------------------------------------------------------
def policy_network_forward(x, params, *, tm_max=2048, split_threshold=512,
                           precision=None):
    """Run the fused, batch-tiled MLP Pallas kernel.

    Args:
      x: (batch, state_dim) float32 states (streamed directly, no padding).
      params: list of (W, b) with W (in, out), b (1, out); W may be bf16.
      tm_max: max rows per batch tile.
      split_threshold: batches above this are split into >=2 tiles so both
        v7x TensorCores get work (harmless on single-TC v5e/v6e).
      precision: optional lax.Precision for the matmuls (f32-faithful path).
    Returns:
      (batch, action_dim) float32 logits.
    """
    batch, state_dim = x.shape
    assert params[0][0].shape[0] == state_dim, "state_dim mismatch with W0"
    action_dim = params[-1][0].shape[1]

    # ---- batch tiling -------------------------------------------------------
    if batch <= split_threshold:
        # Single tile covering the whole (small) batch: block dim == full array
        # dim is always legal regardless of sublane alignment.
        tm = batch
        num_tiles = 1
    else:
        # >=2 tiles (v7x dual-TC), each a multiple of 256 (MXU M-dim, bf16
        # sublane packing), capped at tm_max.  cdiv grid -> ragged last tile is
        # handled by Pallas (OOB reads unspecified, OOB writes dropped); no
        # batch padding / extra HBM pass in the wrapper.
        tm = min(tm_max, _round_up(pl.cdiv(batch, 2), _MXU_M))
        num_tiles = pl.cdiv(batch, tm)

    flat_params = [p for wb in params for p in wb]

    # x streams per batch tile; weights/biases have constant block indices so
    # they are DMA'd from HBM once and stay VMEM-resident across the grid.
    in_specs = [pl.BlockSpec((tm, state_dim), lambda i: (i, 0))]
    for p in flat_params:
        in_specs.append(pl.BlockSpec(p.shape, lambda i: (0, 0)))
    # Lane-narrow (action_dim) output block: masked vst, but it writes only the
    # logical output bytes (HBM bytes, not store slots, are the binding
    # resource here) and removes the old wrapper-side slice pass entirely.
    out_spec = pl.BlockSpec((tm, action_dim), lambda i: (i, 0))

    flops = 2 * batch * sum(int(w.shape[0]) * int(w.shape[1]) for w, _ in params)
    bytes_accessed = (x.size * x.dtype.itemsize
                      + sum(int(p.size) * p.dtype.itemsize for p in flat_params)
                      + batch * action_dim * 4)

    out = pl.pallas_call(
        functools.partial(_mlp_kernel, precision=precision),
        out_shape=jax.ShapeDtypeStruct((batch, action_dim), jnp.float32),
        grid=(num_tiles,),
        in_specs=in_specs,
        out_specs=out_spec,
        compiler_params=pltpu.CompilerParams(
            # Batch tiles are independent -> v7x shards them over its 2 TCs.
            dimension_semantics=("parallel",),
            # Generous vs. the <1 MiB per-tile footprint; safe on all chips
            # (v5e default scoped limit is only 16 MiB) and leaves headroom
            # under v7x's 64 MiB physical VMEM if hidden widths grow.
            vmem_limit_bytes=32 * 1024 * 1024,
        ),
        cost_estimate=pl.CostEstimate(
            flops=flops, transcendentals=0, bytes_accessed=bytes_accessed),
    )(x, *flat_params)
    return out


# ----------------------------------------------------------------------------
# Pure-JAX references / gate
# ----------------------------------------------------------------------------
def _reference_unpadded(x, params):
    """Pure-JAX reference of the original module semantics (f32 weights)."""
    h = x
    for i, (w, b) in enumerate(params):
        h = h @ w + b
        if i < len(params) - 1:
            h = jnp.maximum(h, 0.0)
    return h


def _reference_cast_mirror(x, params):
    """Pure-JAX mirror of the kernel math for reduced-precision weights."""
    h = x.astype(jnp.float32)
    for i, (w, b) in enumerate(params):
        h = jnp.dot(h.astype(w.dtype), w, preferred_element_type=jnp.float32)
        h = h + b.astype(jnp.float32)
        if i < len(params) - 1:
            h = jnp.maximum(h, 0.0)
    return h


def policy_network_forward_auto(x, params, *, min_pallas_batch=256, **kwargs):
    """Gate: tiny batches (launch-overhead bound, ~10K FLOPs) go through plain
    XLA fusion; larger batches use the batch-tiled Pallas kernel."""
    if x.shape[0] < min_pallas_batch:
        return _reference_cast_mirror(x, params)
    return policy_network_forward(x, params, **kwargs)


# ----------------------------------------------------------------------------
# Self-test
# ----------------------------------------------------------------------------
if __name__ == "__main__":
    # Small shapes consistent with the module: state_dim=16, hidden=[32, 32],
    # action_dim=4, batch=8.
    batch = 8
    state_dim = 16
    hidden_units = [32, 32]
    action_dim = 4

    key = jax.random.PRNGKey(0)
    key, xk = jax.random.split(key)
    x = jax.random.normal(xk, (batch, state_dim), jnp.float32)

    params = init_policy_params(key, state_dim, action_dim, hidden_units)

    # 1) f32-weight kernel vs the original module semantics.
    params_f32 = cast_policy_params(params, param_dtype=jnp.float32)
    out_f32 = jax.block_until_ready(policy_network_forward(x, params_f32))
    ref_f32 = _reference_unpadded(x, params)
    assert out_f32.shape == (batch, action_dim)
    assert jnp.allclose(out_f32, ref_f32, atol=1e-4, rtol=1e-4), \
        "f32 kernel mismatch vs reference"

    # 2) bf16-weight kernel (native MXU input dtype, f32 accumulation) vs a
    #    cast-mirrored pure-JAX reference.
    params_bf16 = cast_policy_params(params, param_dtype=jnp.bfloat16)
    out_bf16 = jax.block_until_ready(policy_network_forward(x, params_bf16))
    ref_bf16 = _reference_cast_mirror(x, params_bf16)
    assert out_bf16.shape == (batch, action_dim)
    assert jnp.allclose(out_bf16, ref_bf16, atol=1e-2, rtol=1e-2), \
        "bf16 kernel mismatch vs reference"

    print("KERNEL_OK")
</pallas_src>

<mosaic_0001>
module attributes {stable_mosaic.version = 11 : i64} {
  func.func @_mlp_kernel(%arg0: i32, %arg1: memref<8x16xf32, #tpu.memory_space<vmem>>, %arg2: memref<16x32xf32, #tpu.memory_space<vmem>>, %arg3: memref<1x32xf32, #tpu.memory_space<vmem>>, %arg4: memref<32x32xf32, #tpu.memory_space<vmem>>, %arg5: memref<1x32xf32, #tpu.memory_space<vmem>>, %arg6: memref<32x4xf32, #tpu.memory_space<vmem>>, %arg7: memref<1x4xf32, #tpu.memory_space<vmem>>, %arg8: memref<8x4xf32, #tpu.memory_space<vmem>>) attributes {dimension_semantics = [#tpu.dimension_semantics<parallel>], iteration_bounds = array<i64: 1>, scalar_prefetch = 0 : i64, scratch_operands = 0 : i64, tpu.core_type = #tpu.core_type<tc>, window_params = [{transform_indices = @transform_0, window_bounds = array<i64: 8, 16>}, {pipeline_mode = #tpu.pipeline_mode<synchronous>, transform_indices = @transform_1, window_bounds = array<i64: 16, 32>}, {pipeline_mode = #tpu.pipeline_mode<synchronous>, transform_indices = @transform_2, window_bounds = array<i64: 1, 32>}, {pipeline_mode = #tpu.pipeline_mode<synchronous>, transform_indices = @transform_3, window_bounds = array<i64: 32, 32>}, {pipeline_mode = #tpu.pipeline_mode<synchronous>, transform_indices = @transform_4, window_bounds = array<i64: 1, 32>}, {pipeline_mode = #tpu.pipeline_mode<synchronous>, transform_indices = @transform_5, window_bounds = array<i64: 32, 4>}, {pipeline_mode = #tpu.pipeline_mode<synchronous>, transform_indices = @transform_6, window_bounds = array<i64: 1, 4>}, {transform_indices = @transform_7, window_bounds = array<i64: 8, 4>}]} {
    %c0 = arith.constant 0 : index
    %c0_0 = arith.constant 0 : index
    %0 = vector.load %arg1[%c0, %c0_0] : memref<8x16xf32, #tpu.memory_space<vmem>>, vector<8x16xf32>
    %c0_1 = arith.constant 0 : index
    %c0_2 = arith.constant 0 : index
    %1 = vector.load %arg2[%c0_1, %c0_2] : memref<16x32xf32, #tpu.memory_space<vmem>>, vector<16x32xf32>
    %c0_3 = arith.constant 0 : index
    %c0_4 = arith.constant 0 : index
    %2 = vector.load %arg3[%c0_3, %c0_4] : memref<1x32xf32, #tpu.memory_space<vmem>>, vector<1x32xf32>
    %cst = arith.constant dense<0.000000e+00> : vector<8x32xf32>
    %3 = tpu.matmul %0, %1, %cst {dimension_numbers = #tpu.dot_dimension_numbers<[1], [0], [0], [1], [0, 0, 1, 1], [], []>} : vector<8x16xf32>, vector<16x32xf32>, vector<8x32xf32> -> vector<8x32xf32>
    %4 = vector.broadcast %2 : vector<1x32xf32> to vector<8x32xf32>
    %5 = arith.addf %3, %4 : vector<8x32xf32>
    %cst_5 = arith.constant 0.000000e+00 : f32
    %6 = vector.broadcast %cst_5 : f32 to vector<8x32xf32>
    %7 = arith.maximumf %5, %6 : vector<8x32xf32>
    %c0_6 = arith.constant 0 : index
    %c0_7 = arith.constant 0 : index
    %8 = vector.load %arg4[%c0_6, %c0_7] : memref<32x32xf32, #tpu.memory_space<vmem>>, vector<32x32xf32>
    %c0_8 = arith.constant 0 : index
    %c0_9 = arith.constant 0 : index
    %9 = vector.load %arg5[%c0_8, %c0_9] : memref<1x32xf32, #tpu.memory_space<vmem>>, vector<1x32xf32>
    %cst_10 = arith.constant dense<0.000000e+00> : vector<8x32xf32>
    %10 = tpu.matmul %7, %8, %cst_10 {dimension_numbers = #tpu.dot_dimension_numbers<[1], [0], [0], [1], [0, 0, 1, 1], [], []>} : vector<8x32xf32>, vector<32x32xf32>, vector<8x32xf32> -> vector<8x32xf32>
    %11 = vector.broadcast %9 : vector<1x32xf32> to vector<8x32xf32>
    %12 = arith.addf %10, %11 : vector<8x32xf32>
    %cst_11 = arith.constant 0.000000e+00 : f32
    %13 = vector.broadcast %cst_11 : f32 to vector<8x32xf32>
    %14 = arith.maximumf %12, %13 : vector<8x32xf32>
    %c0_12 = arith.constant 0 : index
    %c0_13 = arith.constant 0 : index
    %15 = vector.load %arg6[%c0_12, %c0_13] : memref<32x4xf32, #tpu.memory_space<vmem>>, vector<32x4xf32>
    %c0_14 = arith.constant 0 : index
    %c0_15 = arith.constant 0 : index
    %16 = vector.load %arg7[%c0_14, %c0_15] : memref<1x4xf32, #tpu.memory_space<vmem>>, vector<1x4xf32>
    %cst_16 = arith.constant dense<0.000000e+00> : vector<8x4xf32>
    %17 = tpu.matmul %14, %15, %cst_16 {dimension_numbers = #tpu.dot_dimension_numbers<[1], [0], [0], [1], [0, 0, 1, 1], [], []>} : vector<8x32xf32>, vector<32x4xf32>, vector<8x4xf32> -> vector<8x4xf32>
    %18 = vector.broadcast %16 : vector<1x4xf32> to vector<8x4xf32>
    %19 = arith.addf %17, %18 : vector<8x4xf32>
    %c0_17 = arith.constant 0 : index
    %c0_18 = arith.constant 0 : index
    %20 = vector.load %arg8[%c0_17, %c0_18] : memref<8x4xf32, #tpu.memory_space<vmem>>, vector<8x4xf32>
    tpu.vector_store %arg8[%c0_17, %c0_18], %19 {strides = array<i32>} : memref<8x4xf32, #tpu.memory_space<vmem>>, vector<8x4xf32>,
    return
  }
  func.func @transform_0(%arg0: i32) -> (i32, i32) {
    %c0_i32 = arith.constant 0 : i32
    %c0_i32_0 = arith.constant 0 : i32
    return %arg0, %c0_i32 : i32, i32
  }
  func.func @transform_1(%arg0: i32) -> (i32, i32) {
    %c0_i32 = arith.constant 0 : i32
    %c0_i32_0 = arith.constant 0 : i32
    %c0_i32_1 = arith.constant 0 : i32
    return %c0_i32, %c0_i32_0 : i32, i32
  }
  func.func @transform_2(%arg0: i32) -> (i32, i32) {
    %c0_i32 = arith.constant 0 : i32
    %c0_i32_0 = arith.constant 0 : i32
    %c0_i32_1 = arith.constant 0 : i32
    return %c0_i32, %c0_i32_0 : i32, i32
  }
  func.func @transform_3(%arg0: i32) -> (i32, i32) {
    %c0_i32 = arith.constant 0 : i32
    %c0_i32_0 = arith.constant 0 : i32
    %c0_i32_1 = arith.constant 0 : i32
    return %c0_i32, %c0_i32_0 : i32, i32
  }
  func.func @transform_4(%arg0: i32) -> (i32, i32) {
    %c0_i32 = arith.constant 0 : i32
    %c0_i32_0 = arith.constant 0 : i32
    %c0_i32_1 = arith.constant 0 : i32
    return %c0_i32, %c0_i32_0 : i32, i32
  }
  func.func @transform_5(%arg0: i32) -> (i32, i32) {
    %c0_i32 = arith.constant 0 : i32
    %c0_i32_0 = arith.constant 0 : i32
    %c0_i32_1 = arith.constant 0 : i32
    return %c0_i32, %c0_i32_0 : i32, i32
  }
  func.func @transform_6(%arg0: i32) -> (i32, i32) {
    %c0_i32 = arith.constant 0 : i32
    %c0_i32_0 = arith.constant 0 : i32
    %c0_i32_1 = arith.constant 0 : i32
    return %c0_i32, %c0_i32_0 : i32, i32
  }
  func.func @transform_7(%arg0: i32) -> (i32, i32) {
    %c0_i32 = arith.constant 0 : i32
    %c0_i32_0 = arith.constant 0 : i32
    return %arg0, %c0_i32 : i32, i32
  }
}

</mosaic_0001>

<bundles_post_ra>
// kernel: tpu_custom_call.1
= control target key start
LH: loop header
LB: loop body
LE: loop exit
PB: predicated region body
PF: predicated region fallthrough
CT: control target
= control target key end

     0   :  { %12 = vsyncpa [#allocation3], 0  ;;  %s506_s0 = inlined_call_operand.vmem [shape: f32[8,16], index: 0, kind: input, shape index: {}]   ;;  %s507_s1 = inlined_call_operand.hbm [shape: f32[16,32], index: 1, kind: input, shape index: {}]   ;;  %s508_s2 = inlined_call_operand.vmem [shape: f32[1,32], index: 2, kind: input, shape index: {}]   ;;  %s509_s3 = inlined_call_operand.vmem [shape: f32[32,32], index: 3, kind: input, shape index: {}]   ;;  %s510_s4 = inlined_call_operand.hbm [shape: f32[1,32], index: 4, kind: input, shape index: {}]   ;;  %s511_s5 = inlined_call_operand.vmem [shape: f32[32,4], index: 5, kind: input, shape index: {}]   ;;  %s512_s6 = inlined_call_operand.vmem [shape: f32[1,4], index: 6, kind: input, shape index: {}]   ;;  %s513_s7 = inlined_call_operand.vmem [shape: f32[8,4], index: 7, kind: output, shape index: {}]  }
   0x1   :  { %13 = vsyncpa [#allocation5], 0  ;;  %s413_s24 = smov [#allocation2]  }
   0x2   :  { %s21_s25 = sshll.u32 %s413_s24, 4  ;;  %s22_s25 = int_to_ptr.vmem [resolvable:$true] %s21_s25 }
   0x3   :  { %s377_s26 = scalar_lea.vmem %s22_s25, 256  ;;  %p382_p1 = scmp.lt.s32.totalorder %s22_s25, %s22_s25 }
   0x4   :  { %p378_p0 = scmp.ne.s32.totalorder %s22_s25, %s377_s26  ;;  %p383_p2 = scmp.lt.s32.totalorder %s377_s26, %s377_s26 }
   0x6   :  { %p384_p3 = por %p383_p2, %p382_p1 }
   0x8   :  { %p385_p4 = pnand %p384_p3, %p378_p0 }
   0xa   :  { %388 = shalt.err (!%p385_p4)
}
   0xb   :  { %s414_s27 = smov 128   ;;  %s415_s28 = smov 8  }
   0xc   :  { %27 = dma.hbm_to_vmem [thread:$0]  %s507_s1, 256, %s22_s25, [#allocation3], %s414_s27, %s414_s27, %s415_s28  }
   0xd   :  { %s416_s8 = smov [#allocation4]  }
   0xe   :  { %s38_s9 = sshll.u32 %s416_s8, 4  ;;  %s39_s9 = int_to_ptr.vmem [resolvable:$true] %s38_s9 }
   0xf   :  { %s397_s10 = scalar_lea.vmem %s39_s9, 16  ;;  %s401_s11 = scalar_lea.vmem %s39_s9, 32 }
  0x10   :  { %p398_p5 = scmp.ne.s32.totalorder %s39_s9, %s397_s10  ;;  %p402_p6 = scmp.lt.s32.totalorder %s39_s9, %s39_s9 }
  0x11   :  { %p403_p7 = scmp.lt.s32.totalorder %s401_s11, %s397_s10 }
  0x13   :  { %p404_p8 = por %p403_p7, %p402_p6 }
  0x15   :  { %p405_p9 = pnand %p404_p8, %p398_p5 }
  0x17   :  { %408 = shalt.err (!%p405_p9)
}
  0x18   :  { %41 = dma.hbm_to_vmem [thread:$0]  %s510_s4, 16, %s39_s9, [#allocation5]  }
  0x19   :  { %409 = dma.done.wait [#allocation3], 256  }
  0x1a   :  { %410 = vsyncadd [#allocation3], 4294967040 }
  0x1b   :  { %411 = dma.done.wait [#allocation5], 16  }
  0x1c   :  { %412 = vsyncadd [#allocation5], 4294967280  ;;  %v417_v0 = vmov 0.0   ;;  %vm418_vm0 = vmmov 0   ;;  %v54_v1 = vld [vmem:[#allocation2 + $0x8] sm:$0xff]  ;;  %v53_v2 = vld [vmem:[#allocation2] sm:$0xff] }
  0x1d   :  { %334 = vmatprep.subr.mxu0 %v417_v0  ;;  %338 = vmatprep.mubr.msk.f32.mxu0 %vm418_vm0, %v417_v0  ;;  %v52_v3 = vld [vmem:[%s506_s0] sm:$0xff]  ;;  %vm62_vm1 = vcmask 130048   ;;  %v140_v4 = vld [vmem:[%s509_s3 + $0x18] sm:$0xff]  ;;  %v139_v5 = vld [vmem:[%s509_s3 + $0x10] sm:$0xff]  ;;  %vm148_vm2 = vcmask 261120   ;;  %vm307_vm3 = vcmask 31744  }
  0x1e   :  { %341 = vmatprep.subr.mxu1 %v417_v0  ;;  %349 = vmatprep.mubr.msk.f32.mxu1 %vm418_vm0, %v417_v0  ;;  %v138_v6 = vld [vmem:[%s509_s3 + $0x8] sm:$0xff]  ;;  %v137_v7 = vld [vmem:[%s509_s3] sm:$0xff]  ;;  %v226_v8 = vld [vmem:[%s511_s5 + $0x18] sm:$0xff] }
  0x1f   :  { %335 = vmatpush3.msra.mxu0 %v54_v1  ;;  %342 = vmatpush3.msra.mxu1 %v140_v4  ;;  %v315_v9 = vld [vmem:[%s508_s2] ss:$0 sm:$0xff]  ;;  %v225_v14 = vld [vmem:[%s511_s5 + $0x10] sm:$0xff]  ;;  %v224_v15 = vld [vmem:[%s511_s5 + $0x8] sm:$0xff] }
  0x20   :  { %336 = vmatprep.subr.mxu0 %v417_v0  ;;  %343 = vmatprep.subr.mxu1 %v417_v0  ;;  %v223_v16 = vld [vmem:[%s511_s5] sm:$0xff]  ;;  %v317_v17 = vld [vmem:[#allocation4] ss:$0 sm:$0xff] }
  0x21   :  { %337 = vmatpush3.msra.mxu0 %v53_v2  ;;  %344 = vmatpush3.msra.mxu1 %v139_v5  ;;  %v319_v22 = vld [vmem:[%s512_s6] ss:$0 sm:$0xff] }
  0x22   :  { %339 = vmatmul.mubr.msk.f32.vlgmr.msra.gmra.mxu0 %vm62_vm1, %v52_v3  ;;  %352 = vmatprep.subr.mxu0 %v417_v0 }
  0x23   :  { %360 = vmatprep.mubr.msk.f32.mxu0 %vm418_vm0, %v417_v0  ;;  %345 = vmatprep.subr.mxu1 %v417_v0 }
  0x24   :  { %346 = vmatpush3.msra.mxu1 %v138_v6  ;;  %353 = vmatpush3.msra.mxu0 %v226_v8 }
  0x25   :  { %347 = vmatprep.subr.mxu1 %v417_v0  ;;  %354 = vmatprep.subr.mxu0 %v417_v0 }
  0x26   :  { %348 = vmatpush3.msra.mxu1 %v137_v7  ;;  %355 = vmatpush3.msra.mxu0 %v225_v14 }
  0x27   :  { %356 = vmatprep.subr.mxu0 %v417_v0 }
  0x28   :  { %357 = vmatpush3.msra.mxu0 %v224_v15 }
  0x29   :  { %358 = vmatprep.subr.mxu0 %v417_v0 }
  0x2a   :  { %359 = vmatpush3.msra.mxu0 %v223_v16 }
  0xe2   :  { %v132_v10 = vpop.f32.mrf.mxu0 }
  0xe3   :  { %v133_v11 = vadd.f32 %v315_v9, %v132_v10 }
  0xe4   :  { %v340_v12 = vpop.f32.mrf.mxu0 }
  0xe5   :  { %v136_v13 = vmax.f32 %v133_v11, 0.0 }
  0xe7   :  { %350 = vmatmul.mubr.msk.f32.vlgmr.msra.gmra.mxu1 %vm148_vm2, %v136_v13 }
 0x1a7   :  { %v218_v18 = vpop.f32.mrf.mxu1 }
 0x1a8   :  { %v219_v19 = vadd.f32 %v317_v17, %v218_v18 }
 0x1a9   :  { %v351_v20 = vpop.f32.mrf.mxu1 }
 0x1aa   :  { %v222_v21 = vmax.f32 %v219_v19, 0.0 }
 0x1ac   :  { %361 = vmatmul.mubr.msk.f32.vlgmr.msra.gmra.mxu0 %vm148_vm2, %v222_v21 }
 0x26c   :  { %v303_v23 = vpop.f32.mrf.mxu0 }
 0x26d   :  { %v304_v24 = vadd.f32 %v319_v22, %v303_v23 }
 0x26e   :  { %v362_v25 = vpop.f32.mrf.mxu0 }
 0x26f   :  { %308 = vst.msk [vmem:[%s513_s7] sm:$0xff] %vm307_vm3, %v304_v24 }
 0x270   :  { %313 = vsyncpa [#allocation3], 1 }
 0x271   :  { %314 = vsyncpa [#allocation5], 1 }

</bundles_post_ra>
